<compile_context>
chip_gen: v7x
topology: tpu7x:2x2x1
jax: 0.10.0
libtpu: 0.0.40
codegen_flags: <defaults>
</compile_context>

<pallas_src>
import functools

import jax
import jax.numpy as jnp
import numpy as np
from jax.experimental import pallas as pl
from jax.experimental.pallas import tpu as pltpu

# ---- model hyper-parameters (module defaults, small input_dim) -------------
INPUT_DIM = 16
H_DIM = 100
ALPHABET_SIZE = 2          # pair-softmax trick below hard-assumes 2
N_LATENT = 10
LATENT_FLAT = ALPHABET_SIZE * N_LATENT
TEMPERATURE = 0.1
BATCH = 8

PAD = 128                  # lane-dense feature padding for every layer
X_OFF = 64                 # x lives in lanes [X_OFF, X_OFF+INPUT_DIM) of the input slab
OUT_OFF = 64               # decoder output lands in lanes [OUT_OFF, OUT_OFF+INPUT_DIM)

# Layout invariants the kernel relies on.
assert ALPHABET_SIZE == 2, "pair-softmax kernel assumes alphabet_size == 2"
assert LATENT_FLAT % 2 == 0
assert LATENT_FLAT <= X_OFF          # logits/gumbel region never overlaps x region
assert X_OFF + INPUT_DIM <= PAD
assert OUT_OFF + INPUT_DIM <= PAD
assert H_DIM <= PAD


def _cdiv(a, b):
    return -(-a // b)


def _round_up(n, m):
    return ((n + m - 1) // m) * m


def vae_fc_kernel(xg_ref, w_ref, b_ref, out_ref, *, temperature):
    """One batch tile. Everything is padded to PAD=128 lanes.

    xg_ref : (TB, PAD)      gumbel noise in lanes 0:LATENT_FLAT, x in lanes X_OFF:X_OFF+INPUT_DIM
    w_ref  : (4, PAD, PAD)  [W1 (rows at X_OFF), W2, W3, W4 (cols at OUT_OFF)], zero-padded
    b_ref  : (8, PAD)       rows 0..3 = b1, b2, b3, b4 (b4 at lanes OUT_OFF:), rows 4..7 zero
    out_ref: (TB, PAD)      logits in lanes 0:LATENT_FLAT, decoder output in lanes OUT_OFF:
    """
    xg = xg_ref[...]                                   # (TB, PAD)
    b1 = b_ref[0:1, :]
    b2 = b_ref[1:2, :]
    b3 = b_ref[2:3, :]
    b4 = b_ref[3:4, :]

    # ---- encoder: Linear -> ReLU -> Linear -> ReLU ----
    # Only W1 rows X_OFF:X_OFF+INPUT_DIM are non-zero, so the gumbel lanes of
    # the packed input never leak into h.
    h = jnp.maximum(
        jnp.dot(xg, w_ref[0], preferred_element_type=jnp.float32) + b1, 0.0)
    enc = jnp.maximum(
        jnp.dot(h, w_ref[1], preferred_element_type=jnp.float32) + b2, 0.0)
    # enc: flat logits in lanes 0:LATENT_FLAT, exact zeros elsewhere
    # (W2 cols >= LATENT_FLAT and b2 lanes >= LATENT_FLAT are exactly zero).

    # ---- gumbel-softmax over adjacent (even, odd) lane pairs ----
    # Adding the whole packed slab only perturbs lanes >= LATENT_FLAT, which
    # hit exactly-zero W3 rows below, so it is harmless.
    y = (enc + xg) * (1.0 / temperature)
    lane = jax.lax.broadcasted_iota(jnp.int32, y.shape, 1)
    # partner[:, i] = y[:, i ^ 1]: neighbour i+1 for even lanes (rotate by
    # PAD-1, i.e. -1 mod PAD), neighbour i-1 for odd lanes (rotate by +1).
    partner = jnp.where(
        (lane & 1) == 0,
        pltpu.roll(y, shift=PAD - 1, axis=1),
        pltpu.roll(y, shift=1, axis=1),
    )
    # alphabet_size == 2 => softmax reduces exactly to a sigmoid of the diff.
    z = 1.0 / (1.0 + jnp.exp(partner - y))

    # ---- decoder: Flatten -> Linear -> ReLU -> Linear ----
    d = jnp.maximum(
        jnp.dot(z, w_ref[2], preferred_element_type=jnp.float32) + b3, 0.0)
    dec = jnp.dot(d, w_ref[3], preferred_element_type=jnp.float32) + b4
    # dec: decoder output in lanes OUT_OFF:OUT_OFF+INPUT_DIM, exact zeros
    # elsewhere; enc is exactly zero there -> pack both outputs in one store.
    out_ref[...] = enc + dec


def init_linear(key, fan_in, fan_out):
    """PyTorch-style default init: U(-1/sqrt(fan_in), 1/sqrt(fan_in))."""
    kw, kb = jax.random.split(key)
    bound = 1.0 / np.sqrt(fan_in)
    w = jax.random.uniform(kw, (fan_in, fan_out), jnp.float32, -bound, bound)
    b = jax.random.uniform(kb, (fan_out,), jnp.float32, -bound, bound)
    return w, b


def make_params(key):
    k1, k2, k3, k4 = jax.random.split(key, 4)
    w1, b1 = init_linear(k1, INPUT_DIM, H_DIM)
    w2, b2 = init_linear(k2, H_DIM, LATENT_FLAT)
    w3, b3 = init_linear(k3, LATENT_FLAT, H_DIM)
    w4, b4 = init_linear(k4, H_DIM, INPUT_DIM)
    return (w1, b1, w2, b2, w3, b3, w4, b4)


def pack_params(params):
    """Zero-pad + pack weights/biases into two VMEM-resident slabs (done once).

    Exact zero padding is load-bearing: W3 rows >= LATENT_FLAT and W4/W2
    columns outside their true ranges must be 0 so junk lanes never leak.
    """
    w1, b1, w2, b2, w3, b3, w4, b4 = params
    w_slab = np.zeros((4, PAD, PAD), np.float32)
    w_slab[0, X_OFF:X_OFF + INPUT_DIM, :H_DIM] = np.asarray(w1)
    w_slab[1, :H_DIM, :LATENT_FLAT] = np.asarray(w2)
    w_slab[2, :LATENT_FLAT, :H_DIM] = np.asarray(w3)
    w_slab[3, :H_DIM, OUT_OFF:OUT_OFF + INPUT_DIM] = np.asarray(w4)
    b_slab = np.zeros((8, PAD), np.float32)
    b_slab[0, :H_DIM] = np.asarray(b1)
    b_slab[1, :LATENT_FLAT] = np.asarray(b2)
    b_slab[2, :H_DIM] = np.asarray(b3)
    b_slab[3, OUT_OFF:OUT_OFF + INPUT_DIM] = np.asarray(b4)
    return jnp.asarray(w_slab), jnp.asarray(b_slab)


def _choose_batch_tile(B):
    """Batch-tile rows per grid step.

    Small B: one tile, padded to a sublane multiple. Large B: ~1024-row tiles
    (near the measured HBM-roofline sweet spot) but always >= 2 tiles so both
    v7x TensorCores get work; TB <= 1024 also keeps the double-buffered VMEM
    footprint well inside v5e's 16 MiB scoped-VMEM default.
    """
    if B <= 512:
        return _round_up(max(B, 8), 8)
    n_tiles = max(2, _cdiv(B, 1024))
    return _round_up(_cdiv(B, n_tiles), 8)


@functools.partial(jax.jit, static_argnames=("temperature",))
def vae_forward(x, w_slab, b_slab, gumbel_noise, temperature=TEMPERATURE):
    B = x.shape[0]
    TB = _choose_batch_tile(B)
    B_pad = _round_up(B, TB)

    # Single packed input slab: gumbel in lanes 0:LATENT_FLAT, x in lanes
    # X_OFF:X_OFF+INPUT_DIM.  One HBM stream instead of two padded ones.
    xg = jnp.zeros((B_pad, PAD), jnp.float32)
    xg = xg.at[:B, :LATENT_FLAT].set(gumbel_noise)
    xg = xg.at[:B, X_OFF:X_OFF + INPUT_DIM].set(x)

    tile_spec = pl.BlockSpec((TB, PAD), lambda i: (i, 0))
    out_pad = pl.pallas_call(
        functools.partial(vae_fc_kernel, temperature=temperature),
        grid=(B_pad // TB,),
        out_shape=jax.ShapeDtypeStruct((B_pad, PAD), jnp.float32),
        in_specs=[
            tile_spec,                                         # packed x+gumbel tile
            pl.BlockSpec((4, PAD, PAD), lambda i: (0, 0, 0)),  # weight slab (resident)
            pl.BlockSpec((8, PAD), lambda i: (0, 0)),          # bias slab (resident)
        ],
        out_specs=tile_spec,                                   # packed logits+output tile
        compiler_params=pltpu.CompilerParams(
            dimension_semantics=("parallel",)),
    )(xg, w_slab, b_slab)

    logits = out_pad[:B, :LATENT_FLAT].reshape(B, N_LATENT, ALPHABET_SIZE)
    output = out_pad[:B, OUT_OFF:OUT_OFF + INPUT_DIM]
    return logits, output


def vae_forward_ref(x, params, gumbel_noise, temperature=TEMPERATURE):
    """Pure-JAX reference of the PyTorch forward (for a sanity check)."""
    w1, b1, w2, b2, w3, b3, w4, b4 = params
    h = jax.nn.relu(x @ w1 + b1)
    logits_flat = jax.nn.relu(h @ w2 + b2)
    logits = logits_flat.reshape(-1, N_LATENT, ALPHABET_SIZE)
    y = (logits_flat + gumbel_noise) / temperature
    z = jax.nn.softmax(y.reshape(-1, N_LATENT, ALPHABET_SIZE), axis=-1)
    d = jax.nn.relu(z.reshape(-1, LATENT_FLAT) @ w3 + b3)
    out = d @ w4 + b4
    return logits, out


if __name__ == "__main__":
    key = jax.random.PRNGKey(0)
    k_params, k_x, k_gumbel = jax.random.split(key, 3)

    params = make_params(k_params)
    w_slab, b_slab = pack_params(params)

    x = jax.random.normal(k_x, (BATCH, INPUT_DIM), jnp.float32)

    # deterministic Gumbel(0,1) noise for the gumbel-softmax sampling step
    u = jax.random.uniform(k_gumbel, (BATCH, LATENT_FLAT), jnp.float32,
                           minval=1e-20, maxval=1.0)
    gumbel_noise = -jnp.log(-jnp.log(u))

    logits, output = vae_forward(x, w_slab, b_slab, gumbel_noise)
    jax.block_until_ready((logits, output))

    assert logits.shape == (BATCH, N_LATENT, ALPHABET_SIZE)
    assert output.shape == (BATCH, INPUT_DIM)
    assert bool(jnp.all(jnp.isfinite(logits))) and bool(jnp.all(jnp.isfinite(output)))

    # Sanity check against the pure-JAX reference.  Tolerances are loose only
    # because MXU f32 matmuls may use a different internal precision than the
    # XLA reference matmuls (amplified by the 1/temperature = 10x scale).
    logits_ref, output_ref = vae_forward_ref(x, params, gumbel_noise)
    np.testing.assert_allclose(np.asarray(logits), np.asarray(logits_ref),
                               rtol=5e-2, atol=5e-2)
    np.testing.assert_allclose(np.asarray(output), np.asarray(output_ref),
                               rtol=1e-1, atol=1e-1)

    print("KERNEL_OK")
</pallas_src>

<mosaic_0001>
module attributes {stable_mosaic.version = 11 : i64} {
  func.func @vae_fc_kernel(%arg0: i32, %arg1: memref<8x128xf32, #tpu.memory_space<vmem>>, %arg2: memref<4x128x128xf32, #tpu.memory_space<vmem>>, %arg3: memref<8x128xf32, #tpu.memory_space<vmem>>, %arg4: memref<8x128xf32, #tpu.memory_space<vmem>>) attributes {dimension_semantics = [#tpu.dimension_semantics<parallel>], iteration_bounds = array<i64: 1>, scalar_prefetch = 0 : i64, scratch_operands = 0 : i64, tpu.core_type = #tpu.core_type<tc>, window_params = [{transform_indices = @transform_0, window_bounds = array<i64: 8, 128>}, {pipeline_mode = #tpu.pipeline_mode<synchronous>, transform_indices = @transform_1, window_bounds = array<i64: 4, 128, 128>}, {pipeline_mode = #tpu.pipeline_mode<synchronous>, transform_indices = @transform_2, window_bounds = array<i64: 8, 128>}, {transform_indices = @transform_3, window_bounds = array<i64: 8, 128>}]} {
    %c0 = arith.constant 0 : index
    %c0_0 = arith.constant 0 : index
    %0 = vector.load %arg1[%c0, %c0_0] : memref<8x128xf32, #tpu.memory_space<vmem>>, vector<8x128xf32>
    %c0_1 = arith.constant 0 : index
    %c0_2 = arith.constant 0 : index
    %1 = vector.load %arg3[%c0_1, %c0_2] : memref<8x128xf32, #tpu.memory_space<vmem>>, vector<1x128xf32>
    %c1 = arith.constant 1 : index
    %c0_3 = arith.constant 0 : index
    %2 = vector.load %arg3[%c1, %c0_3] : memref<8x128xf32, #tpu.memory_space<vmem>>, vector<1x128xf32>
    %c2 = arith.constant 2 : index
    %c0_4 = arith.constant 0 : index
    %3 = vector.load %arg3[%c2, %c0_4] : memref<8x128xf32, #tpu.memory_space<vmem>>, vector<1x128xf32>
    %c3 = arith.constant 3 : index
    %c0_5 = arith.constant 0 : index
    %4 = vector.load %arg3[%c3, %c0_5] : memref<8x128xf32, #tpu.memory_space<vmem>>, vector<1x128xf32>
    %c0_6 = arith.constant 0 : index
    %c0_7 = arith.constant 0 : index
    %c0_8 = arith.constant 0 : index
    %5 = vector.load %arg2[%c0_6, %c0_7, %c0_8] : memref<4x128x128xf32, #tpu.memory_space<vmem>>, vector<1x128x128xf32>
    %6 = vector.shape_cast %5 : vector<1x128x128xf32> to vector<128x128xf32>
    %cst = arith.constant dense<0.000000e+00> : vector<8x128xf32>
    %7 = tpu.matmul %0, %6, %cst {dimension_numbers = #tpu.dot_dimension_numbers<[1], [0], [0], [1], [0, 0, 1, 1], [], []>} : vector<8x128xf32>, vector<128x128xf32>, vector<8x128xf32> -> vector<8x128xf32>
    %8 = vector.broadcast %1 : vector<1x128xf32> to vector<8x128xf32>
    %9 = arith.addf %7, %8 : vector<8x128xf32>
    %cst_9 = arith.constant 0.000000e+00 : f32
    %10 = vector.broadcast %cst_9 : f32 to vector<8x128xf32>
    %11 = arith.maximumf %9, %10 : vector<8x128xf32>
    %c1_10 = arith.constant 1 : index
    %c0_11 = arith.constant 0 : index
    %c0_12 = arith.constant 0 : index
    %12 = vector.load %arg2[%c1_10, %c0_11, %c0_12] : memref<4x128x128xf32, #tpu.memory_space<vmem>>, vector<1x128x128xf32>
    %13 = vector.shape_cast %12 : vector<1x128x128xf32> to vector<128x128xf32>
    %cst_13 = arith.constant dense<0.000000e+00> : vector<8x128xf32>
    %14 = tpu.matmul %11, %13, %cst_13 {dimension_numbers = #tpu.dot_dimension_numbers<[1], [0], [0], [1], [0, 0, 1, 1], [], []>} : vector<8x128xf32>, vector<128x128xf32>, vector<8x128xf32> -> vector<8x128xf32>
    %15 = vector.broadcast %2 : vector<1x128xf32> to vector<8x128xf32>
    %16 = arith.addf %14, %15 : vector<8x128xf32>
    %cst_14 = arith.constant 0.000000e+00 : f32
    %17 = vector.broadcast %cst_14 : f32 to vector<8x128xf32>
    %18 = arith.maximumf %16, %17 : vector<8x128xf32>
    %19 = arith.addf %18, %0 : vector<8x128xf32>
    %cst_15 = arith.constant 1.000000e+01 : f32
    %20 = vector.broadcast %cst_15 : f32 to vector<8x128xf32>
    %21 = arith.mulf %19, %20 : vector<8x128xf32>
    %22 = tpu.iota {dimensions = array<i32: 1>} : vector<8x128xi32>
    %c1_i32 = arith.constant 1 : i32
    %23 = vector.broadcast %c1_i32 : i32 to vector<8x128xi32>
    %24 = arith.andi %22, %23 : vector<8x128xi32>
    %c0_i32 = arith.constant 0 : i32
    %25 = vector.broadcast %c0_i32 : i32 to vector<8x128xi32>
    %26 = arith.cmpi eq, %24, %25 : vector<8x128xi32>
    %c127_i32 = arith.constant 127 : i32
    %27 = tpu.dynamic_rotate %21 by %c127_i32 dim 1 : vector<8x128xf32>, i32 -> vector<8x128xf32>
    %c1_i32_16 = arith.constant 1 : i32
    %28 = tpu.dynamic_rotate %21 by %c1_i32_16 dim 1 : vector<8x128xf32>, i32 -> vector<8x128xf32>
    %29 = arith.select %26, %27, %28 : vector<8x128xi1>, vector<8x128xf32>
    %30 = arith.subf %29, %21 : vector<8x128xf32>
    %31 = math.exp %30 : vector<8x128xf32>
    %cst_17 = arith.constant 1.000000e+00 : f32
    %32 = vector.broadcast %cst_17 : f32 to vector<8x128xf32>
    %33 = arith.addf %32, %31 : vector<8x128xf32>
    %cst_18 = arith.constant 1.000000e+00 : f32
    %34 = vector.broadcast %cst_18 : f32 to vector<8x128xf32>
    %35 = arith.divf %34, %33 : vector<8x128xf32>
    %c2_19 = arith.constant 2 : index
    %c0_20 = arith.constant 0 : index
    %c0_21 = arith.constant 0 : index
    %36 = vector.load %arg2[%c2_19, %c0_20, %c0_21] : memref<4x128x128xf32, #tpu.memory_space<vmem>>, vector<1x128x128xf32>
    %37 = vector.shape_cast %36 : vector<1x128x128xf32> to vector<128x128xf32>
    %cst_22 = arith.constant dense<0.000000e+00> : vector<8x128xf32>
    %38 = tpu.matmul %35, %37, %cst_22 {dimension_numbers = #tpu.dot_dimension_numbers<[1], [0], [0], [1], [0, 0, 1, 1], [], []>} : vector<8x128xf32>, vector<128x128xf32>, vector<8x128xf32> -> vector<8x128xf32>
    %39 = vector.broadcast %3 : vector<1x128xf32> to vector<8x128xf32>
    %40 = arith.addf %38, %39 : vector<8x128xf32>
    %cst_23 = arith.constant 0.000000e+00 : f32
    %41 = vector.broadcast %cst_23 : f32 to vector<8x128xf32>
    %42 = arith.maximumf %40, %41 : vector<8x128xf32>
    %c3_24 = arith.constant 3 : index
    %c0_25 = arith.constant 0 : index
    %c0_26 = arith.constant 0 : index
    %43 = vector.load %arg2[%c3_24, %c0_25, %c0_26] : memref<4x128x128xf32, #tpu.memory_space<vmem>>, vector<1x128x128xf32>
    %44 = vector.shape_cast %43 : vector<1x128x128xf32> to vector<128x128xf32>
    %cst_27 = arith.constant dense<0.000000e+00> : vector<8x128xf32>
    %45 = tpu.matmul %42, %44, %cst_27 {dimension_numbers = #tpu.dot_dimension_numbers<[1], [0], [0], [1], [0, 0, 1, 1], [], []>} : vector<8x128xf32>, vector<128x128xf32>, vector<8x128xf32> -> vector<8x128xf32>
    %46 = vector.broadcast %4 : vector<1x128xf32> to vector<8x128xf32>
    %47 = arith.addf %45, %46 : vector<8x128xf32>
    %48 = arith.addf %18, %47 : vector<8x128xf32>
    %c0_28 = arith.constant 0 : index
    %c0_29 = arith.constant 0 : index
    %49 = vector.load %arg4[%c0_28, %c0_29] : memref<8x128xf32, #tpu.memory_space<vmem>>, vector<8x128xf32>
    tpu.vector_store %arg4[%c0_28, %c0_29], %48 {strides = array<i32>} : memref<8x128xf32, #tpu.memory_space<vmem>>, vector<8x128xf32>,
    return
  }
  func.func @transform_0(%arg0: i32) -> (i32, i32) {
    %c0_i32 = arith.constant 0 : i32
    %c0_i32_0 = arith.constant 0 : i32
    return %arg0, %c0_i32 : i32, i32
  }
  func.func @transform_1(%arg0: i32) -> (i32, i32, i32) {
    %c0_i32 = arith.constant 0 : i32
    %c0_i32_0 = arith.constant 0 : i32
    %c0_i32_1 = arith.constant 0 : i32
    %c0_i32_2 = arith.constant 0 : i32
    return %c0_i32, %c0_i32_0, %c0_i32_1 : i32, i32, i32
  }
  func.func @transform_2(%arg0: i32) -> (i32, i32) {
    %c0_i32 = arith.constant 0 : i32
    %c0_i32_0 = arith.constant 0 : i32
    %c0_i32_1 = arith.constant 0 : i32
    return %c0_i32, %c0_i32_0 : i32, i32
  }
  func.func @transform_3(%arg0: i32) -> (i32, i32) {
    %c0_i32 = arith.constant 0 : i32
    %c0_i32_0 = arith.constant 0 : i32
    return %arg0, %c0_i32 : i32, i32
  }
}

</mosaic_0001>

<bundles_post_ra>
// kernel: vae_forward.1
= control target key start
LH: loop header
LB: loop body
LE: loop exit
PB: predicated region body
PF: predicated region fallthrough
CT: control target
= control target key end

     0   :  { %8 = vsyncpa [#allocation3], 0  ;;  %s767_s12 = smov [#allocation2]   ;;  %s877_s0 = inlined_call_operand.vmem [shape: f32[8,128], index: 0, kind: input, shape index: {}]   ;;  %s878_s1 = inlined_call_operand.hbm [shape: f32[4,128,128], index: 1, kind: input, shape index: {}]   ;;  %s879_s2 = inlined_call_operand.vmem [shape: f32[8,128], index: 2, kind: input, shape index: {}]   ;;  %s880_s3 = inlined_call_operand.vmem [shape: f32[8,128], index: 3, kind: output, shape index: {}]  }
   0x1   :  { %s16_s13 = sshll.u32 %s767_s12, 4  ;;  %s743_s16 = scalar_lea.hbm %s878_s1, 8192  ;;  %s17_s13 = int_to_ptr.vmem [resolvable:$true] %s16_s13 }
   0x2   :  { %p744_p0 = scmp.ne.s32.totalorder %s878_s1, %s743_s16  ;;  %p747_p1 = scmp.lt.u32.totalorder %s743_s16, %s878_s1 }
   0x4   :  { %p749_p2 = pnand %p747_p1, %p744_p0 }
   0x6   :  { %752 = shalt.err (!%p749_p2)
}
   0x7   :  { %s753_s21 = scalar_lea.vmem %s17_s13, 8192  ;;  %p758_p4 = scmp.lt.s32.totalorder %s17_s13, %s17_s13 }
   0x8   :  { %p754_p3 = scmp.ne.s32.totalorder %s17_s13, %s753_s21  ;;  %p759_p5 = scmp.lt.s32.totalorder %s753_s21, %s753_s21 }
   0xa   :  { %p760_p6 = por %p759_p5, %p758_p4 }
   0xc   :  { %p761_p7 = pnand %p760_p6, %p754_p3 }
   0xe   :  { %764 = shalt.err (!%p761_p7)
}
   0xf   :  { %s768_s22 = smov 128   ;;  %s769_s23 = smov 8  }
  0x10   :  { %22 = dma.hbm_to_vmem [thread:$0]  %s878_s1, 8192, %s17_s13, [#allocation3], %s768_s22, %s768_s22, %s769_s23  }
  0x11   :  { %765 = dma.done.wait [#allocation3], 8192  }
  0x12   :  { %766 = vsyncadd [#allocation3], 4294959104  ;;  %v770_v0 = vmov 0.0|0.0   ;;  %vm771_vm0 = vmmov 0   ;;  %v772_v1 = vmov 0.0   ;;  %v33_v2 = vld [vmem:[#allocation2] sm:$0xff] }
  0x13   :  { %635 = vmatprep.subr.bf16.mxu0 %v770_v0  ;;  %527 = vmatprep.mubr.msk.f32.mxu0 %vm771_vm0, %v772_v1  ;;  %v34_v3 = vld [vmem:[#allocation2 + $0x8] sm:$0xff]  ;;  %v35_v4 = vld [vmem:[#allocation2 + $0x10] sm:$0xff]  ;;  %v36_v6 = vld [vmem:[#allocation2 + $0x18] sm:$0xff]  ;;  %s773_s30 = smov 127   ;;  %s774_s4 = smov 1  }
  0x14   :  { %659 = vmatprep.subr.bf16.mxu1 %v770_v0  ;;  %562 = vmatprep.mubr.msk.f32.mxu1 %vm771_vm0, %v772_v1  ;;  %v636_v5 = vpack.c.bf16 %v34_v3, %v33_v2  ;;  %v639_v7 = vpack.c.bf16 %v36_v6, %v35_v4  ;;  %v37_v8 = vld [vmem:[#allocation2 + $0x20] sm:$0xff]  ;;  %v38_v9 = vld [vmem:[#allocation2 + $0x28] sm:$0xff]  ;;  %v127_v12 = vld [vmem:[#allocation2 + $0x90] sm:$0xff] }
  0x15   :  { %v125_v10 = vld [vmem:[#allocation2 + $0x80] sm:$0xff]  ;;  %v126_v11 = vld [vmem:[#allocation2 + $0x88] sm:$0xff]  ;;  %v128_v13 = vld [vmem:[#allocation2 + $0x98] sm:$0xff]  ;;  %v642_v14 = vpack.c.bf16 %v38_v9, %v37_v8 }
  0x16   :  { %637 = vmatpush3.bf16.msra.mxu0 %v636_v5  ;;  %v660_v15 = vpack.c.bf16 %v126_v11, %v125_v10  ;;  %v39_v16 = vld [vmem:[#allocation2 + $0x30] sm:$0xff]  ;;  %v40_v17 = vld [vmem:[#allocation2 + $0x38] sm:$0xff]  ;;  %v663_v18 = vpack.c.bf16 %v128_v13, %v127_v12  ;;  %v129_v19 = vld [vmem:[#allocation2 + $0xa0] sm:$0xff] }
  0x17   :  { %638 = vmatprep.subr.bf16.mxu0 %v770_v0  ;;  %v130_v20 = vld [vmem:[#allocation2 + $0xa8] sm:$0xff]  ;;  %v645_v21 = vpack.c.bf16 %v40_v17, %v39_v16  ;;  %v41_v22 = vld [vmem:[#allocation2 + $0x40] sm:$0xff]  ;;  %v131_v25 = vld [vmem:[#allocation2 + $0xb0] sm:$0xff] }
  0x18   :  { %661 = vmatpush3.bf16.msra.mxu1 %v660_v15  ;;  %v42_v23 = vld [vmem:[#allocation2 + $0x48] sm:$0xff]  ;;  %v666_v24 = vpack.c.bf16 %v130_v20, %v129_v19  ;;  %v132_v26 = vld [vmem:[#allocation2 + $0xb8] sm:$0xff]  ;;  %v43_v28 = vld [vmem:[#allocation2 + $0x50] sm:$0xff] }
  0x19   :  { %662 = vmatprep.subr.bf16.mxu1 %v770_v0  ;;  %v648_v27 = vpack.c.bf16 %v42_v23, %v41_v22  ;;  %v44_v29 = vld [vmem:[#allocation2 + $0x58] sm:$0xff]  ;;  %v669_v30 = vpack.c.bf16 %v132_v26, %v131_v25  ;;  %v133_v31 = vld [vmem:[#allocation2 + $0xc0] sm:$0xff]  ;;  %v134_v32 = vld [vmem:[#allocation2 + $0xc8] sm:$0xff] }
  0x1a   :  { %640 = vmatpush3.bf16.msra.mxu0 %v639_v7  ;;  %v651_v33 = vpack.c.bf16 %v44_v29, %v43_v28  ;;  %v45_v34 = vld [vmem:[#allocation2 + $0x60] sm:$0xff]  ;;  %v46_v35 = vld [vmem:[#allocation2 + $0x68] sm:$0xff]  ;;  %v672_v36 = vpack.c.bf16 %v134_v32, %v133_v31  ;;  %v135_v37 = vld [vmem:[#allocation2 + $0xd0] sm:$0xff] }
  0x1b   :  { %641 = vmatprep.subr.bf16.mxu0 %v770_v0  ;;  %v136_v38 = vld [vmem:[#allocation2 + $0xd8] sm:$0xff]  ;;  %v654_v39 = vpack.c.bf16 %v46_v35, %v45_v34  ;;  %v47_v40 = vld [vmem:[#allocation2 + $0x70] sm:$0xff]  ;;  %v137_v43 = vld [vmem:[#allocation2 + $0xe0] sm:$0xff] }
  0x1c   :  { %664 = vmatpush3.bf16.msra.mxu1 %v663_v18  ;;  %v48_v41 = vld [vmem:[#allocation2 + $0x78] sm:$0xff]  ;;  %v675_v42 = vpack.c.bf16 %v136_v38, %v135_v37  ;;  %v138_v44 = vld [vmem:[#allocation2 + $0xe8] sm:$0xff]  ;;  %v28_v47 = vld [vmem:[%s877_s0] sm:$0xff] }
  0x1d   :  { %665 = vmatprep.subr.bf16.mxu1 %v770_v0  ;;  %v657_v45 = vpack.c.bf16 %v48_v41, %v47_v40  ;;  %v678_v46 = vpack.c.bf16 %v138_v44, %v137_v43  ;;  %v139_v48 = vld [vmem:[#allocation2 + $0xf0] sm:$0xff]  ;;  %v140_v49 = vld [vmem:[#allocation2 + $0xf8] sm:$0xff]  ;;  %v423_v51 = vld [vmem:[%s879_s2] ss:$0 sm:$0xff] }
  0x1e   :  { %643 = vmatpush3.bf16.msra.mxu0 %v642_v14  ;;  %v681_v50 = vpack.c.bf16 %v140_v49, %v139_v48  ;;  %v234_v56 = vld [vmem:[#allocation2 + $0x100] sm:$0xff]  ;;  %v235_v57 = vld [vmem:[#allocation2 + $0x108] sm:$0xff]  ;;  %v236_v60 = vld [vmem:[#allocation2 + $0x110] sm:$0xff] }
  0x1f   :  { %644 = vmatprep.subr.bf16.mxu0 %v770_v0  ;;  %v684_v58 = vpack.c.bf16 %v235_v57, %v234_v56  ;;  %v424_v59 = vld [vmem:[%s879_s2 + $0x1] ss:$0 sm:$0xff]  ;;  %v237_v61 = vld [vmem:[#allocation2 + $0x118] sm:$0xff]  ;;  %v239_v5 = vld [vmem:[#allocation2 + $0x128] sm:$0xff] }
  0x20   :  { %667 = vmatpush3.bf16.msra.mxu1 %v666_v24  ;;  %v687_v63 = vpack.c.bf16 %v237_v61, %v236_v60  ;;  %v238_v4 = vld [vmem:[#allocation2 + $0x120] sm:$0xff]  ;;  %v240_v9 = vld [vmem:[#allocation2 + $0x130] sm:$0xff]  ;;  %v241_v10 = vld [vmem:[#allocation2 + $0x138] sm:$0xff] }
  0x21   :  { %668 = vmatprep.subr.bf16.mxu1 %v770_v0  ;;  %v690_v6 = vpack.c.bf16 %v239_v5, %v238_v4  ;;  %v693_v11 = vpack.c.bf16 %v241_v10, %v240_v9  ;;  %v242_v12 = vld [vmem:[#allocation2 + $0x140] sm:$0xff]  ;;  %v243_v13 = vld [vmem:[#allocation2 + $0x148] sm:$0xff]  ;;  %v244_v15 = vld [vmem:[#allocation2 + $0x150] sm:$0xff] }
  0x22   :  { %646 = vmatpush3.bf16.msra.mxu0 %v645_v21  ;;  %v696_v14 = vpack.c.bf16 %v243_v13, %v242_v12  ;;  %v245_v16 = vld [vmem:[#allocation2 + $0x158] sm:$0xff]  ;;  %v246_v18 = vld [vmem:[#allocation2 + $0x160] sm:$0xff]  ;;  %v247_v19 = vld [vmem:[#allocation2 + $0x168] sm:$0xff] }
  0x23   :  { %647 = vmatprep.subr.bf16.mxu0 %v770_v0  ;;  %v699_v17 = vpack.c.bf16 %v245_v16, %v244_v15  ;;  %v702_v20 = vpack.c.bf16 %v247_v19, %v246_v18  ;;  %v248_v21 = vld [vmem:[#allocation2 + $0x170] sm:$0xff]  ;;  %v249_v22 = vld [vmem:[#allocation2 + $0x178] sm:$0xff]  ;;  %v326_v24 = vld [vmem:[#allocation2 + $0x180] sm:$0xff] }
  0x24   :  { %670 = vmatpush3.bf16.msra.mxu1 %v669_v30  ;;  %v705_v23 = vpack.c.bf16 %v249_v22, %v248_v21  ;;  %v327_v25 = vld [vmem:[#allocation2 + $0x188] sm:$0xff]  ;;  %v328_v26 = vld [vmem:[#allocation2 + $0x190] sm:$0xff]  ;;  %v329_v28 = vld [vmem:[#allocation2 + $0x198] sm:$0xff] }
  0x25   :  { %671 = vmatprep.subr.bf16.mxu1 %v770_v0  ;;  %v711_v29 = vpack.c.bf16 %v329_v28, %v328_v26  ;;  %v330_v30 = vld [vmem:[#allocation2 + $0x1a0] sm:$0xff]  ;;  %v331_v31 = vld [vmem:[#allocation2 + $0x1a8] sm:$0xff]  ;;  %v333_v34 = vld [vmem:[#allocation2 + $0x1b8] sm:$0xff] }
  0x26   :  { %649 = vmatpush3.bf16.msra.mxu0 %v648_v27  ;;  %v708_v27 = vpack.c.bf16 %v327_v25, %v326_v24  ;;  %v714_v32 = vpack.c.bf16 %v331_v31, %v330_v30  ;;  %v335_v37 = vld [vmem:[#allocation2 + $0x1c8] sm:$0xff]  ;;  %v337_v40 = vld [vmem:[#allocation2 + $0x1d8] sm:$0xff]  ;;  %v340_v56 = vld [vmem:[#allocation2 + $0x1f0] sm:$0xff] }
  0x27   :  { %650 = vmatprep.subr.bf16.mxu0 %v770_v0  ;;  %v339_v43 = vld [vmem:[#allocation2 + $0x1e8] sm:$0xff]  ;;  %v341_v57 = vld [vmem:[#allocation2 + $0x1f8] sm:$0xff] }
  0x28   :  { %673 = vmatpush3.bf16.msra.mxu1 %v672_v36  ;;  %v334_v36 = vld [vmem:[#allocation2 + $0x1c0] sm:$0xff] }
  0x29   :  { %674 = vmatprep.subr.bf16.mxu1 %v770_v0  ;;  %v720_v38 = vpack.c.bf16 %v335_v37, %v334_v36 }
  0x2a   :  { %652 = vmatpush3.bf16.msra.mxu0 %v651_v33  ;;  %v332_v33 = vld [vmem:[#allocation2 + $0x1b0] sm:$0xff] }
  0x2b   :  { %653 = vmatprep.subr.bf16.mxu0 %v770_v0  ;;  %v717_v35 = vpack.c.bf16 %v333_v34, %v332_v33 }
  0x2c   :  { %676 = vmatpush3.bf16.msra.mxu1 %v675_v42  ;;  %v338_v42 = vld [vmem:[#allocation2 + $0x1e0] sm:$0xff] }
  0x2d   :  { %677 = vmatprep.subr.bf16.mxu1 %v770_v0  ;;  %v726_v44 = vpack.c.bf16 %v339_v43, %v338_v42 }
  0x2e   :  { %655 = vmatpush3.bf16.msra.mxu0 %v654_v39  ;;  %v336_v39 = vld [vmem:[#allocation2 + $0x1d0] sm:$0xff] }
  0x2f   :  { %656 = vmatprep.subr.bf16.mxu0 %v770_v0  ;;  %v723_v41 = vpack.c.bf16 %v337_v40, %v336_v39 }
  0x30   :  { %679 = vmatpush3.bf16.msra.mxu1 %v678_v46 }
  0x31   :  { %680 = vmatprep.subr.bf16.mxu1 %v770_v0 }
  0x32   :  { %658 = vmatpush3.bf16.msra.mxu0 %v657_v45  ;;  %v218_v45 = vlaneseq }
  0x33   :  { %683 = vmatprep.subr.bf16.mxu0 %v770_v0 }
  0x34   :  { %682 = vmatpush3.bf16.msra.mxu1 %v681_v50  ;;  %v219_v46 = vand.u32 127, %v218_v45 }
  0x35   :  { %528 = vmatmul.mubr.f32.vlgmr.msra.gmra.mrb[0].mxu0 %v28_v47  ;;  %707 = vmatprep.subr.bf16.mxu1 %v770_v0 }
  0x36   :  { %597 = vmatprep.mubr.msk.f32.mxu0 %vm771_vm0, %v772_v1  ;;  %685 = vmatpush3.bf16.msra.mxu0 %v684_v58  ;;  %v729_v58 = vpack.c.bf16 %v341_v57, %v340_v56 }
  0x37   :  { %686 = vmatprep.subr.bf16.mxu0 %v770_v0 }
  0x3a   :  { %688 = vmatpush3.bf16.msra.mxu0 %v687_v63  ;;  %v426_v63 = vld [vmem:[%s879_s2 + $0x3] ss:$0 sm:$0xff] }
  0x3b   :  { %689 = vmatprep.subr.bf16.mxu0 %v770_v0 }
  0x3e   :  { %691 = vmatpush3.bf16.msra.mxu0 %v690_v6 }
  0x3f   :  { %692 = vmatprep.subr.bf16.mxu0 %v770_v0 }
  0x42   :  { %694 = vmatpush3.bf16.msra.mxu0 %v693_v11 }
  0x43   :  { %695 = vmatprep.subr.bf16.mxu0 %v770_v0 }
  0x46   :  { %697 = vmatpush3.bf16.msra.mxu0 %v696_v14 }
  0x47   :  { %698 = vmatprep.subr.bf16.mxu0 %v770_v0 }
  0x4a   :  { %700 = vmatpush3.bf16.msra.mxu0 %v699_v17 }
  0x4b   :  { %701 = vmatprep.subr.bf16.mxu0 %v770_v0 }
  0x4e   :  { %703 = vmatpush3.bf16.msra.mxu0 %v702_v20 }
  0x4f   :  { %704 = vmatprep.subr.bf16.mxu0 %v770_v0 }
  0x52   :  { %706 = vmatpush3.bf16.msra.mxu0 %v705_v23 }
 0x108   :  { %v119_v52 = vpop.f32.mrb[0].mxu0 }
 0x109   :  { %v120_v53 = vadd.f32 %v423_v51, %v119_v52  ;;  %v529_v54 = vpop.f32.mrb[1].mxu0 }
 0x10b   :  { %v123_v55 = vmax.f32 %v120_v53, 0.0 }
 0x10d   :  { %563 = vmatmul.mubr.f32.vlgmr.msra.gmra.mrb[0].mxu1 %v123_v55 }
 0x10e   :  { %632 = vmatprep.mubr.msk.f32.mxu1 %vm771_vm0, %v772_v1  ;;  %709 = vmatpush3.bf16.msra.mxu1 %v708_v27 }
 0x10f   :  { %710 = vmatprep.subr.bf16.mxu1 %v770_v0 }
 0x112   :  { %712 = vmatpush3.bf16.msra.mxu1 %v711_v29 }
 0x113   :  { %713 = vmatprep.subr.bf16.mxu1 %v770_v0 }
 0x116   :  { %715 = vmatpush3.bf16.msra.mxu1 %v714_v32 }
 0x117   :  { %716 = vmatprep.subr.bf16.mxu1 %v770_v0 }
 0x11a   :  { %718 = vmatpush3.bf16.msra.mxu1 %v717_v35 }
 0x11b   :  { %719 = vmatprep.subr.bf16.mxu1 %v770_v0 }
 0x11e   :  { %721 = vmatpush3.bf16.msra.mxu1 %v720_v38 }
 0x11f   :  { %722 = vmatprep.subr.bf16.mxu1 %v770_v0 }
 0x122   :  { %724 = vmatpush3.bf16.msra.mxu1 %v723_v41 }
 0x123   :  { %725 = vmatprep.subr.bf16.mxu1 %v770_v0 }
 0x126   :  { %727 = vmatpush3.bf16.msra.mxu1 %v726_v44 }
 0x127   :  { %728 = vmatprep.subr.bf16.mxu1 %v770_v0  ;;  %v425_v0 = vld [vmem:[%s879_s2 + $0x2] ss:$0 sm:$0xff] }
 0x12a   :  { %730 = vmatpush3.bf16.msra.mxu1 %v729_v58 }
 0x1e0   :  { %v211_v62 = vpop.f32.mrb[0].mxu1 }
 0x1e1   :  { %v843_v2 = vadd.f32 %v424_v59, %v211_v62  ;;  %v564_v3 = vpop.f32.mrb[1].mxu1 }
 0x1e3   :  { %v215_v1 = vmax.f32 %v843_v2, 0.0 }
 0x1e5   :  { %v216_v7 = vadd.f32 %v215_v1, %v28_v47  ;;  %v220_v47 = vand.u32 1, %v219_v46 }
 0x1e7   :  { %v849_v8 = vmul.f32 10.0, %v216_v7  ;;  %vm221_vm1 = vcmp.eq.s32.totalorder %v220_v47, 0 }
 0x1e9   :  { %222 = vrot.lane.b32.xlu0 %v849_v8, %s773_s30 }
 0x1ed   :  { %224 = vrot.lane.b32.xlu0 %v849_v8, %s774_s4 }
 0x25b   :  { %v223_v48 = vpop.permute.xlu0 %222 }
 0x25f   :  { %v225_v49 = vpop.permute.xlu0 %224 }
 0x260   :  { %v226_v50 = vsel %vm221_vm1, %v223_v48, %v225_v49 }
 0x261   :  { %v227_v51 = vsub.f32 %v226_v50, %v849_v8 }
 0x263   :  { %v228_v52 = vmul.f32 1.442695, %v227_v51 }
 0x265   :  { %739 = vpow2.f32 %v228_v52 }
 0x26f   :  { %v740_v53 = vpop.eup %739 }
 0x270   :  { %v230_v54 = vadd.f32 1.0, %v740_v53 }
 0x272   :  { %741 = vrcp.f32 %v230_v54 }
 0x27c   :  { %v742_v55 = vpop.eup %741 }
 0x27d   :  { %598 = vmatmul.mubr.f32.vlgmr.msra.gmra.mrb[2].mxu0 %v742_v55 }
 0x350   :  { %v320_v59 = vpop.f32.mrb[2].mxu0 }
 0x351   :  { %v321_v60 = vadd.f32 %v425_v0, %v320_v59  ;;  %v599_v61 = vpop.f32.mrb[3].mxu0 }
 0x353   :  { %v324_v62 = vmax.f32 %v321_v60, 0.0 }
 0x355   :  { %633 = vmatmul.mubr.f32.vlgmr.msra.gmra.mrb[2].mxu1 %v324_v62 }
 0x428   :  { %v412_v3 = vpop.f32.mrb[2].mxu1 }
 0x429   :  { %v413_v4 = vadd.f32 %v426_v63, %v412_v3  ;;  %v634_v5 = vpop.f32.mrb[3].mxu1 }
 0x42b   :  { %v416_v6 = vadd.f32 %v413_v4, %v215_v1 }
 0x42d   :  { %417 = vst [vmem:[%s880_s3] sm:$0xff] %v416_v6 }
 0x42e   :  { %422 = vsyncpa [#allocation3], 1 }

</bundles_post_ra>
